<compile_context>
chip_gen: v6e
topology: v6e:2x2x1
jax: 0.10.0
libtpu: 0.0.40
codegen_flags: <defaults>
</compile_context>

<pallas_src>
import jax
import jax.numpy as jnp
from jax.experimental import pallas as pl
from jax.experimental.pallas import tpu as pltpu

LANE = 512  # lane-dense: multiple of the 128-lane vreg width


def _clamp_kernel(threshold):
    """Kernel closure clamping its tile to [0, threshold].

    threshold is a Python float (matches the nn.Module constructor arg), so a
    compile-time splat via closure is optimal.  Note the bound is materialized
    in the tensor dtype (bf16 thresholds round, integer thresholds truncate).
    # TODO(synk): if threshold ever becomes a traced scalar, switch to a
    # scalar-prefetch SMEM argument (PrefetchScalarGridSpec num_scalar_prefetch=1).
    """
    def kernel(x_ref, o_ref):
        x = x_ref[...]
        zero = jnp.zeros((), dtype=x.dtype)
        hi = jnp.asarray(threshold, dtype=x.dtype)
        # clamp(x, 0, threshold) == min(max(x, 0), threshold)
        o_ref[...] = jnp.minimum(jnp.maximum(x, zero), hi)
    return kernel


def _round_up(a, b):
    return ((a + b - 1) // b) * b


def _block_bytes_target():
    """Per-block byte budget (chip-aware).

    v7x: 4 MiB blocks -> 16 MiB double-buffered in+out, fine in 64 MiB VMEM,
         and per-step overhead drops under ~10% at 3.2 TB/s HBM.
    v6e: 2 MiB blocks -> 8 MiB total, ~roofline already.
    v5e / unknown: 1 MiB blocks -> 4 MiB total, safely under the 16 MiB
         scoped-VMEM default; DMA per step already hides grid overhead.
    """
    try:
        kind = jax.devices()[0].device_kind.lower()
    except Exception:  # pragma: no cover - defensive, keeps CPU tracing alive
        kind = ""
    if "v7" in kind:
        return 4 << 20
    if "v6" in kind:
        return 2 << 20
    return 1 << 20


def relu_threshold(x, threshold):
    """Pallas implementation of torch.clamp(x, 0, threshold) for any-rank x."""
    orig_shape = x.shape
    orig_dtype = x.dtype
    n = int(x.size)
    if n == 0:
        return x

    itemsize = jnp.dtype(orig_dtype).itemsize
    sublane = max(8, 32 // itemsize)  # 8 for f32, 16 for bf16, 32 for i8

    rows_needed = -(-n // LANE)

    # Row tile sized by the per-chip block-byte budget; both block dims are
    # multiples of the (sublane, 128) tiling rule.
    blk_bytes = _block_bytes_target()
    tr = max(sublane, (blk_bytes // (LANE * itemsize)) // sublane * sublane)
    if rows_needed <= tr:
        # Small input: still split into multiple grid steps (target >= 8) so a
        # megacore / dual-TC chip can shard the "parallel" axis.
        tr = max(sublane, _round_up(-(-rows_needed // 8), sublane))
    grid = (pl.cdiv(rows_needed, tr),)

    # Lane-align only: pad by < LANE elements.  When n % LANE == 0 (the common
    # NN case) there is no pad and no slice-back at all; the remainder *block*
    # along the row axis is handled by Pallas masking, not by array padding.
    flat = x.reshape(-1)
    pad = (-n) % LANE
    if pad:
        flat = jnp.pad(flat, (0, pad))
    x2 = flat.reshape(rows_needed, LANE)

    compiler_params = pltpu.CompilerParams(
        dimension_semantics=("parallel",),
        # Let the tiny tail-pad producer fuse into the pallas_call operand
        # instead of materializing a full extra HBM pass (ragged sizes only).
        allow_input_fusion=[True] if pad else None,
    )

    out = pl.pallas_call(
        _clamp_kernel(threshold),
        out_shape=jax.ShapeDtypeStruct((rows_needed, LANE), orig_dtype),
        grid_spec=pltpu.PrefetchScalarGridSpec(
            num_scalar_prefetch=0,
            grid=grid,
            in_specs=[pl.BlockSpec((tr, LANE), lambda i: (i, 0))],
            out_specs=pl.BlockSpec((tr, LANE), lambda i: (i, 0)),
        ),
        compiler_params=compiler_params,
        cost_estimate=pl.CostEstimate(
            flops=2 * n,
            bytes_accessed=2 * n * itemsize,
            transcendentals=0,
        ),
    )(x2)

    if pad:
        return out.reshape(-1)[:n].reshape(orig_shape)
    return out.reshape(orig_shape)


if __name__ == "__main__":
    key = jax.random.PRNGKey(0)
    threshold = 1.5

    # Small NCHW input consistent with a conv-style module: (N=2, C=4, H=16, W=16).
    # 2048 elements -> lane-aligned: no pad, no slice-back.
    x = jax.random.normal(key, (2, 4, 16, 16), dtype=jnp.float32) * 3.0
    y = jax.block_until_ready(relu_threshold(x, threshold))
    y_ref = jnp.clip(x, 0.0, threshold)
    assert y.shape == x.shape and y.dtype == x.dtype
    assert jnp.allclose(y, y_ref), "mismatch vs reference clamp (NCHW case)"

    # Ragged element count: exercises the <512-element tail pad + slice-back.
    x2 = jax.random.normal(jax.random.PRNGKey(1), (3, 5, 7, 11), dtype=jnp.float32) * 3.0
    y2 = jax.block_until_ready(relu_threshold(x2, threshold))
    assert jnp.allclose(y2, jnp.clip(x2, 0.0, threshold)), "mismatch (ragged case)"

    # Multi-block with a masked remainder block (20 rows, row-tile of 8).
    x3 = jax.random.normal(jax.random.PRNGKey(2), (2, 5, 32, 32), dtype=jnp.float32) * 3.0
    y3 = jax.block_until_ready(relu_threshold(x3, threshold))
    assert jnp.allclose(y3, jnp.clip(x3, 0.0, threshold)), "mismatch (remainder-block case)"

    print("KERNEL_OK")
</pallas_src>

<mosaic_0001>
module attributes {stable_mosaic.version = 11 : i64} {
  func.func @kernel(%arg0: i32, %arg1: memref<8x512xf32, #tpu.memory_space<vmem>>, %arg2: memref<8x512xf32, #tpu.memory_space<vmem>>) attributes {dimension_semantics = [#tpu.dimension_semantics<parallel>], iteration_bounds = array<i64: 1>, scalar_prefetch = 0 : i64, scratch_operands = 0 : i64, tpu.core_type = #tpu.core_type<tc>, window_params = [{transform_indices = @transform_0, window_bounds = array<i64: 8, 512>}, {transform_indices = @transform_1, window_bounds = array<i64: 8, 512>}]} {
    %c0 = arith.constant 0 : index
    %c0_0 = arith.constant 0 : index
    %0 = vector.load %arg1[%c0, %c0_0] : memref<8x512xf32, #tpu.memory_space<vmem>>, vector<8x512xf32>
    %cst = arith.constant 0.000000e+00 : f32
    %1 = vector.broadcast %cst : f32 to vector<8x512xf32>
    %2 = arith.maximumf %0, %1 : vector<8x512xf32>
    %cst_1 = arith.constant 1.500000e+00 : f32
    %3 = vector.broadcast %cst_1 : f32 to vector<8x512xf32>
    %4 = arith.minimumf %2, %3 : vector<8x512xf32>
    %c0_2 = arith.constant 0 : index
    %c0_3 = arith.constant 0 : index
    %5 = vector.load %arg2[%c0_2, %c0_3] : memref<8x512xf32, #tpu.memory_space<vmem>>, vector<8x512xf32>
    tpu.vector_store %arg2[%c0_2, %c0_3], %4 {strides = array<i32>} : memref<8x512xf32, #tpu.memory_space<vmem>>, vector<8x512xf32>,
    return
  }
  func.func @transform_0(%arg0: i32) -> (i32, i32) {
    %c0_i32 = arith.constant 0 : i32
    %c0_i32_0 = arith.constant 0 : i32
    return %arg0, %c0_i32 : i32, i32
  }
  func.func @transform_1(%arg0: i32) -> (i32, i32) {
    %c0_i32 = arith.constant 0 : i32
    %c0_i32_0 = arith.constant 0 : i32
    return %arg0, %c0_i32 : i32, i32
  }
}

</mosaic_0001>

<bundles_post_ra>
// kernel: tpu_custom_call.1
= control target key start
LH: loop header
LB: loop body
LE: loop exit
PB: predicated region body
PF: predicated region fallthrough
CT: control target
= control target key end

     0   :  { %6 = vsyncpa [#allocation3], 0  ;;  %s130_s0 = inlined_call_operand.hbm [shape: f32[4,512], index: 0, kind: input, shape index: {}]   ;;  %s131_s1 = inlined_call_operand.hbm [shape: f32[4,512], index: 1, kind: output, shape index: {}]  }
   0x1   :  { %7 = vsyncpa [#allocation4], 0 }
   0x2   :  { %12 = vsyncadd [#allocation3], 256  ;;  %s104_s6 = smov [#allocation2]  }
   0x3   :  { %s13_s7 = sshll.u32 %s104_s6, 4  ;;  %s14_s7 = int_to_ptr.vmem [resolvable:$true] %s13_s7 }
   0x4   :  { %s68_s8 = scalar_lea.vmem %s14_s7, 256  ;;  %s72_s9 = scalar_lea.vmem %s14_s7, 512 }
   0x5   :  { %p69_p0 = scmp.ne.s32.totalorder %s14_s7, %s68_s8  ;;  %p73_p1 = scmp.lt.s32.totalorder %s14_s7, %s14_s7 }
   0x6   :  { %p74_p2 = scmp.lt.s32.totalorder %s72_s9, %s68_s8 }
   0x8   :  { %p75_p3 = por %p74_p2, %p73_p1 }
   0xa   :  { %p76_p4 = pnand %p75_p3, %p69_p0 }
   0xc   :  { %79 = shalt.err (!%p76_p4)
}
   0xd   :  { %s105_s10 = smov 256   ;;  %s106_s11 = smov 16  }
   0xe   :  { %19 = dma.hbm_to_vmem [thread:$0]  %s130_s0, 256, %s14_s7, [#allocation3], %s105_s10, %s105_s10, %s106_s11  }
   0xf   :  { %100 = dma.done.wait [#allocation3], 512  }
  0x10   :  { %101 = vsyncadd [#allocation3], 4294966784  ;;  %v23_v0 = vld [vmem:[#allocation2] sm:$0xff]  ;;  %v24_v1 = vld [vmem:[#allocation2 + $0x8] sm:$0xff] }
  0x11   :  { %v25_v2 = vld [vmem:[#allocation2 + $0x10] sm:$0xff]  ;;  %v27_v3 = vmax.f32 %v23_v0, 0.0  ;;  %v28_v4 = vmax.f32 %v24_v1, 0.0  ;;  %v26_v6 = vld [vmem:[#allocation2 + $0x18] sm:$0xff] }
  0x12   :  { %v29_v5 = vmax.f32 %v25_v2, 0.0  ;;  %v30_v7 = vmax.f32 %v26_v6, 0.0 }
  0x13   :  { %v31_v8 = vmin.f32 %v27_v3, 1.5  ;;  %v32_v9 = vmin.f32 %v28_v4, 1.5 }
  0x14   :  { %v33_v10 = vmin.f32 %v29_v5, 1.5  ;;  %v34_v11 = vmin.f32 %v30_v7, 1.5 }
  0x15   :  { %35 = vst [vmem:[#allocation5] sm:$0xff] %v31_v8  ;;  %36 = vst [vmem:[#allocation5 + $0x8] sm:$0xff] %v32_v9 }
  0x16   :  { %37 = vst [vmem:[#allocation5 + $0x10] sm:$0xff] %v33_v10  ;;  %38 = vst [vmem:[#allocation5 + $0x18] sm:$0xff] %v34_v11 }
  0x17   :  { %43 = vsyncadd [#allocation4], 256  ;;  %s107_s0 = smov [#allocation5]  }
  0x18   :  { %s44_s14 = sshll.u32 %s107_s0, 4  ;;  %s45_s14 = int_to_ptr.vmem [resolvable:$true] %s44_s14 }
  0x19   :  { %s80_s15 = scalar_lea.vmem %s45_s14, 256  ;;  %s84_s16 = scalar_lea.vmem %s45_s14, 512 }
  0x1a   :  { %p81_p5 = scmp.ne.s32.totalorder %s45_s14, %s80_s15  ;;  %p85_p6 = scmp.lt.s32.totalorder %s45_s14, %s45_s14 }
  0x1b   :  { %p86_p7 = scmp.lt.s32.totalorder %s84_s16, %s80_s15 }
  0x1d   :  { %p87_p8 = por %p86_p7, %p85_p6 }
  0x1f   :  { %p88_p9 = pnand %p87_p8, %p81_p5 }
  0x21   :  { %91 = shalt.err (!%p88_p9)
}
  0x22   :  { %50 = dma.vmem_to_hbm [thread:$0]  %s45_s14, 256, %s131_s1, [#allocation4], %s105_s10, %s105_s10, %s106_s11  }
  0x23   :  { %102 = dma.done.wait [#allocation4], 512  }
  0x24   :  { %103 = vsyncadd [#allocation4], 4294966784 }
  0x25   :  { %54 = vsyncpa [#allocation3], 1 }
  0x26   :  { %55 = vsyncpa [#allocation4], 1 }

</bundles_post_ra>
